<compile_context>
chip_gen: v6e
topology: v6e:2x2x1
jax: 0.10.0
libtpu: 0.0.40
codegen_flags: <defaults>
</compile_context>

<pallas_src>
import functools

import jax
import jax.numpy as jnp
from jax import lax
from jax.experimental import pallas as pl
from jax.experimental.pallas import tpu as pltpu

DROP_P = 0.2
KEEP_P = 1.0 - DROP_P
LANE = 128


def _round_up(x, m):
    return (x + m - 1) // m * m


def _default_vmem_limit():
    # Explicit scoped-VMEM limit: ~7/8 of physical per-core VMEM (falls back to
    # 64 MiB if the query is unavailable).  The default scoped limit (16/32 MiB)
    # is hit long before physical VMEM on larger graphs.
    try:
        return int(pltpu.get_tpu_info().vmem_capacity_bytes * 7 // 8)
    except Exception:
        return 64 * 1024 * 1024


_VMEM_LIMIT = _default_vmem_limit()


def _layer1_kernel(a_ref, xw1_ref, b1_ref, w2_ref, mask_ref, d_ref,
                   hw_ref, acc_ref):
    """Phase 1: HW_scaled = diag(d) @ (dropout(relu(Â @ X @ W1 + b1)) @ W2).

    Â is decomposed as diag(d) A_bin diag(d); the right diag(d) is already
    folded into xw1 (rows pre-scaled in the wrapper), the left diag(d) is
    applied to the accumulated rows here (d_ref).  The extra diag(d) factor on
    the output pre-folds the right normalization needed by phase 2.
    """
    k = pl.program_id(1)

    @pl.when(k == 0)
    def _():
        acc_ref[...] = jnp.zeros_like(acc_ref)

    # int8 {0,1} tile -> bf16 for the MXU; f32 accumulation.
    acc_ref[...] += jnp.dot(a_ref[...].astype(jnp.bfloat16), xw1_ref[...],
                            preferred_element_type=jnp.float32)

    @pl.when(k == pl.num_programs(1) - 1)
    def _():
        h = acc_ref[...] * d_ref[...] + b1_ref[...]
        h = jnp.maximum(h, 0.0)
        h = h * mask_ref[...].astype(jnp.float32)   # 0.0 or 1/keep_p
        hw = jnp.dot(h.astype(jnp.bfloat16), w2_ref[...],
                     preferred_element_type=jnp.float32)
        hw_ref[...] = (hw * d_ref[...]).astype(hw_ref.dtype)


def _layer2_kernel(o_valid, a_ref, hws_ref, b2_ref, d_ref, o_ref, acc_ref):
    """Phase 2: out = softmax(diag(d) @ (A_bin @ HW_scaled) + b2, axis=1)."""
    k = pl.program_id(1)

    @pl.when(k == 0)
    def _():
        acc_ref[...] = jnp.zeros_like(acc_ref)

    acc_ref[...] += jnp.dot(a_ref[...].astype(jnp.bfloat16), hws_ref[...],
                            preferred_element_type=jnp.float32)

    @pl.when(k == pl.num_programs(1) - 1)
    def _():
        z = acc_ref[...] * d_ref[...] + b2_ref[...]
        # Mask padded output columns so softmax normalizes only over real features.
        col = lax.broadcasted_iota(jnp.int32, z.shape, 1)
        z = jnp.where(col < o_valid, z, -jnp.inf)
        z = z - jnp.max(z, axis=-1, keepdims=True)
        e = jnp.exp(z)
        denom = jnp.sum(e, axis=-1, keepdims=True)
        o_ref[...] = (e * pl.reciprocal(denom, approx=True)).astype(o_ref.dtype)


@jax.jit
def gae_forward(dropout_key, a_bin, d_inv_sqrt, x, w1, b1, w2, b2):
    """Forward pass.  a_bin: int8 binary (A + I); d_inv_sqrt: (N,) f32."""
    n, _ = x.shape
    h_dim = w1.shape[1]
    o_dim = w2.shape[1]

    # Tile size for both grid axes (rows of Â tile and K contraction slab).
    if n >= 2048:
        tile = 512
    elif n >= 512:
        tile = 256
    else:
        tile = LANE
    n_pad = _round_up(n, tile)
    h_pad = _round_up(h_dim, LANE)
    o_pad = _round_up(o_dim, LANE)

    # Hoisted feature transform (f32, O(N·F·H) — negligible vs the N^2 stream),
    # with the right D^{-1/2} factor folded into its rows; then pad + bf16.
    xw1 = jnp.dot(x, w1) * d_inv_sqrt[:, None]

    a_p = jnp.zeros((n_pad, n_pad), jnp.int8).at[:n, :n].set(a_bin)
    xw1_p = jnp.zeros((n_pad, h_pad), jnp.bfloat16).at[:n, :h_dim].set(
        xw1.astype(jnp.bfloat16))
    b1_p = jnp.zeros((1, h_pad), jnp.float32).at[:, :h_dim].set(b1.reshape(1, -1))
    w2_p = jnp.zeros((h_pad, o_pad), jnp.bfloat16).at[:h_dim, :o_dim].set(
        w2.astype(jnp.bfloat16))
    b2_p = jnp.zeros((1, o_pad), jnp.float32).at[:, :o_dim].set(b2.reshape(1, -1))
    d_p = jnp.zeros((n_pad, 1), jnp.float32).at[:n, 0].set(d_inv_sqrt)

    # Dropout keep-mask: 0.0 (dropped) or 1/keep_p (kept); both exact in bf16.
    keep = jax.random.bernoulli(dropout_key, KEEP_P, (n_pad, h_pad))
    mask = (keep.astype(jnp.float32) * jnp.float32(1.0 / KEEP_P)).astype(jnp.bfloat16)

    grid = (n_pad // tile, n_pad // tile)     # (row tiles, K tiles) — K last.
    params = pltpu.CompilerParams(
        dimension_semantics=("parallel", "arbitrary"),
        vmem_limit_bytes=_VMEM_LIMIT)

    row_k = lambda i, k: (i, k)
    row_only = lambda i, k: (i, 0)
    k_only = lambda i, k: (k, 0)
    const = lambda i, k: (0, 0)

    # Phase 1: HW_scaled = diag(d) (dropout(relu(Â X W1 + b1)) W2)    (bf16).
    hw_scaled = pl.pallas_call(
        _layer1_kernel,
        out_shape=jax.ShapeDtypeStruct((n_pad, o_pad), jnp.bfloat16),
        grid=grid,
        in_specs=[
            pl.BlockSpec((tile, tile), row_k),                   # A_bin tile (int8)
            pl.BlockSpec((tile, h_pad), k_only),                 # d·(X@W1) K-slab
            pl.BlockSpec((1, h_pad), const,
                         pipeline_mode=pl.Buffered(1)),          # b1 (resident)
            pl.BlockSpec((h_pad, o_pad), const,
                         pipeline_mode=pl.Buffered(1)),          # W2 (resident)
            pl.BlockSpec((tile, h_pad), row_only),               # dropout mask rows
            pl.BlockSpec((tile, 1), row_only),                   # d^{-1/2} rows
        ],
        out_specs=pl.BlockSpec((tile, o_pad), row_only),
        scratch_shapes=[pltpu.VMEM((tile, h_pad), jnp.float32)],
        compiler_params=params,
    )(a_p, xw1_p, b1_p, w2_p, mask, d_p)

    # Phase 2: out = softmax(diag(d) (A_bin @ HW_scaled) + b2, axis=1).
    out = pl.pallas_call(
        functools.partial(_layer2_kernel, o_dim),
        out_shape=jax.ShapeDtypeStruct((n_pad, o_pad), jnp.float32),
        grid=grid,
        in_specs=[
            pl.BlockSpec((tile, tile), row_k),                   # A_bin tile (int8)
            pl.BlockSpec((tile, o_pad), k_only),                 # HW_scaled K-slab
            pl.BlockSpec((1, o_pad), const,
                         pipeline_mode=pl.Buffered(1)),          # b2 (resident)
            pl.BlockSpec((tile, 1), row_only),                   # d^{-1/2} rows
        ],
        out_specs=pl.BlockSpec((tile, o_pad), row_only),
        scratch_shapes=[pltpu.VMEM((tile, o_pad), jnp.float32)],
        compiler_params=params,
    )(a_p, hw_scaled, b2_p, d_p)

    return out[:n, :o_dim]


def binary_normalized_adjacency(edge_index, num_nodes):
    """(A + I) as int8 {0,1} and the D^{-1/2} vector, from a [2, E] edge_index.

    Self-loop weight stays 1 even if edge_index already contains self-loops
    (matches PyG gcn_norm / add_remaining_self_loops).
    """
    src, dst = edge_index[0], edge_index[1]
    a = jnp.zeros((num_nodes, num_nodes), jnp.float32)
    a = a.at[src, dst].set(1.0)
    a = jnp.maximum(a, jnp.eye(num_nodes, dtype=jnp.float32))  # add self loops
    deg = jnp.sum(a, axis=1)
    d_inv_sqrt = jnp.where(deg > 0, 1.0 / jnp.sqrt(deg), 0.0)
    return a.astype(jnp.int8), d_inv_sqrt


if __name__ == "__main__":
    # Small shapes consistent with the module: N nodes, F features, hidden H, out O.
    N, F, H, O = 8, 4, 32, 16

    key = jax.random.PRNGKey(0)
    k_x, k_e, k_w1, k_w2, k_drop = jax.random.split(key, 5)

    # Node features.
    x = jax.random.normal(k_x, (N, F), dtype=jnp.float32)

    # Deterministic random edge list (16 directed edges), symmetrized.
    src = jax.random.randint(k_e, (16,), 0, N)
    dst = jnp.roll(src, 3)
    edge_index = jnp.stack(
        [jnp.concatenate([src, dst]), jnp.concatenate([dst, src])], axis=0
    )
    a_bin, d_inv_sqrt = binary_normalized_adjacency(edge_index, N)

    # Deterministic parameter init (Glorot-uniform-ish weights, zero biases).
    def glorot(k, shape):
        limit = jnp.sqrt(6.0 / (shape[0] + shape[1]))
        return jax.random.uniform(k, shape, jnp.float32, -limit, limit)

    w1 = glorot(k_w1, (F, H))
    b1 = jnp.zeros((1, H), jnp.float32)
    w2 = glorot(k_w2, (H, O))
    b2 = jnp.zeros((1, O), jnp.float32)

    out = gae_forward(k_drop, a_bin, d_inv_sqrt, x, w1, b1, w2, b2)
    jax.block_until_ready(out)

    assert out.shape == (N, O)
    # Rows of the output are softmax distributions -> should sum to ~1
    # (tolerance covers the approximate EUP reciprocal + bf16 intermediates).
    row_sums = jnp.sum(out, axis=1)
    assert bool(jnp.all(jnp.abs(row_sums - 1.0) < 5e-3))
    assert bool(jnp.all(jnp.isfinite(out)))
    assert bool(jnp.all(out >= 0.0))

    print("KERNEL_OK")
</pallas_src>

<mosaic_0001>
module attributes {stable_mosaic.version = 11 : i64} {
  func.func @_layer1_kernel(%arg0: i32, %arg1: i32, %arg2: memref<128x128xi8, #tpu.memory_space<vmem>>, %arg3: memref<128x128xbf16, #tpu.memory_space<vmem>>, %arg4: memref<1x128xf32, #tpu.memory_space<vmem>>, %arg5: memref<128x128xbf16, #tpu.memory_space<vmem>>, %arg6: memref<128x128xbf16, #tpu.memory_space<vmem>>, %arg7: memref<128x1xf32, #tpu.memory_space<vmem>>, %arg8: memref<128x128xbf16, #tpu.memory_space<vmem>>, %arg9: memref<128x128xf32, #tpu.memory_space<vmem>>) attributes {dimension_semantics = [#tpu.dimension_semantics<parallel>, #tpu.dimension_semantics<arbitrary>], iteration_bounds = array<i64: 1, 1>, scalar_prefetch = 0 : i64, scratch_operands = 1 : i64, tpu.core_type = #tpu.core_type<tc>, window_params = [{transform_indices = @transform_0, window_bounds = array<i64: 128, 128>}, {transform_indices = @transform_1, window_bounds = array<i64: 128, 128>}, {pipeline_mode = #tpu.pipeline_mode<synchronous>, transform_indices = @transform_2, window_bounds = array<i64: 1, 128>}, {pipeline_mode = #tpu.pipeline_mode<synchronous>, transform_indices = @transform_3, window_bounds = array<i64: 128, 128>}, {transform_indices = @transform_4, window_bounds = array<i64: 128, 128>}, {transform_indices = @transform_5, window_bounds = array<i64: 128, 1>}, {transform_indices = @transform_6, window_bounds = array<i64: 128, 128>}]} {
    %c0_i32 = arith.constant 0 : i32
    %0 = arith.cmpi eq, %arg1, %c0_i32 : i32
    %1 = arith.extui %0 : i1 to i32
    %c0_i32_0 = arith.constant 0 : i32
    %2 = arith.cmpi ne, %1, %c0_i32_0 : i32
    scf.if %2 {
      %cst_10 = arith.constant 0.000000e+00 : f32
      %13 = vector.broadcast %cst_10 : f32 to vector<128x128xf32>
      %c0_11 = arith.constant 0 : index
      %c0_12 = arith.constant 0 : index
      %14 = vector.load %arg9[%c0_11, %c0_12] : memref<128x128xf32, #tpu.memory_space<vmem>>, vector<128x128xf32>
      tpu.vector_store %arg9[%c0_11, %c0_12], %13 {strides = array<i32>} : memref<128x128xf32, #tpu.memory_space<vmem>>, vector<128x128xf32>,
    } else {
    }
    %c0 = arith.constant 0 : index
    %c0_1 = arith.constant 0 : index
    %3 = vector.load %arg9[%c0, %c0_1] : memref<128x128xf32, #tpu.memory_space<vmem>>, vector<128x128xf32>
    %c0_2 = arith.constant 0 : index
    %c0_3 = arith.constant 0 : index
    %4 = vector.load %arg2[%c0_2, %c0_3] : memref<128x128xi8, #tpu.memory_space<vmem>>, vector<128x128xi8>
    %5 = arith.sitofp %4 : vector<128x128xi8> to vector<128x128xbf16>
    %c0_4 = arith.constant 0 : index
    %c0_5 = arith.constant 0 : index
    %6 = vector.load %arg3[%c0_4, %c0_5] : memref<128x128xbf16, #tpu.memory_space<vmem>>, vector<128x128xbf16>
    %cst = arith.constant dense<0.000000e+00> : vector<128x128xf32>
    %7 = tpu.matmul %5, %6, %cst {dimension_numbers = #tpu.dot_dimension_numbers<[1], [0], [0], [1], [0, 0, 1, 1], [], []>} : vector<128x128xbf16>, vector<128x128xbf16>, vector<128x128xf32> -> vector<128x128xf32>
    %8 = arith.addf %3, %7 : vector<128x128xf32>
    %c0_6 = arith.constant 0 : index
    %c0_7 = arith.constant 0 : index
    %9 = vector.load %arg9[%c0_6, %c0_7] : memref<128x128xf32, #tpu.memory_space<vmem>>, vector<128x128xf32>
    tpu.vector_store %arg9[%c0_6, %c0_7], %8 {strides = array<i32>} : memref<128x128xf32, #tpu.memory_space<vmem>>, vector<128x128xf32>,
    %c0_i32_8 = arith.constant 0 : i32
    %10 = arith.cmpi eq, %arg1, %c0_i32_8 : i32
    %11 = arith.extui %10 : i1 to i32
    %c0_i32_9 = arith.constant 0 : i32
    %12 = arith.cmpi ne, %11, %c0_i32_9 : i32
    scf.if %12 {
      %c0_10 = arith.constant 0 : index
      %c0_11 = arith.constant 0 : index
      %13 = vector.load %arg9[%c0_10, %c0_11] : memref<128x128xf32, #tpu.memory_space<vmem>>, vector<128x128xf32>
      %c0_12 = arith.constant 0 : index
      %c0_13 = arith.constant 0 : index
      %14 = vector.load %arg7[%c0_12, %c0_13] : memref<128x1xf32, #tpu.memory_space<vmem>>, vector<128x1xf32>
      %15 = vector.broadcast %14 : vector<128x1xf32> to vector<128x128xf32>
      %16 = arith.mulf %13, %15 : vector<128x128xf32>
      %c0_14 = arith.constant 0 : index
      %c0_15 = arith.constant 0 : index
      %17 = vector.load %arg4[%c0_14, %c0_15] : memref<1x128xf32, #tpu.memory_space<vmem>>, vector<1x128xf32>
      %18 = vector.broadcast %17 : vector<1x128xf32> to vector<128x128xf32>
      %19 = arith.addf %16, %18 : vector<128x128xf32>
      %cst_16 = arith.constant 0.000000e+00 : f32
      %20 = vector.broadcast %cst_16 : f32 to vector<128x128xf32>
      %21 = arith.maximumf %19, %20 : vector<128x128xf32>
      %c0_17 = arith.constant 0 : index
      %c0_18 = arith.constant 0 : index
      %22 = vector.load %arg6[%c0_17, %c0_18] : memref<128x128xbf16, #tpu.memory_space<vmem>>, vector<128x128xbf16>
      %23 = arith.extf %22 : vector<128x128xbf16> to vector<128x128xf32>
      %24 = arith.mulf %21, %23 : vector<128x128xf32>
      %25 = arith.truncf %24 : vector<128x128xf32> to vector<128x128xbf16>
      %c0_19 = arith.constant 0 : index
      %c0_20 = arith.constant 0 : index
      %26 = vector.load %arg5[%c0_19, %c0_20] : memref<128x128xbf16, #tpu.memory_space<vmem>>, vector<128x128xbf16>
      %cst_21 = arith.constant dense<0.000000e+00> : vector<128x128xf32>
      %27 = tpu.matmul %25, %26, %cst_21 {dimension_numbers = #tpu.dot_dimension_numbers<[1], [0], [0], [1], [0, 0, 1, 1], [], []>} : vector<128x128xbf16>, vector<128x128xbf16>, vector<128x128xf32> -> vector<128x128xf32>
      %c0_22 = arith.constant 0 : index
      %c0_23 = arith.constant 0 : index
      %28 = vector.load %arg7[%c0_22, %c0_23] : memref<128x1xf32, #tpu.memory_space<vmem>>, vector<128x1xf32>
      %29 = vector.broadcast %28 : vector<128x1xf32> to vector<128x128xf32>
      %30 = arith.mulf %27, %29 : vector<128x128xf32>
      %31 = arith.truncf %30 : vector<128x128xf32> to vector<128x128xbf16>
      %c0_24 = arith.constant 0 : index
      %c0_25 = arith.constant 0 : index
      %32 = vector.load %arg8[%c0_24, %c0_25] : memref<128x128xbf16, #tpu.memory_space<vmem>>, vector<128x128xbf16>
      tpu.vector_store %arg8[%c0_24, %c0_25], %31 {strides = array<i32>} : memref<128x128xbf16, #tpu.memory_space<vmem>>, vector<128x128xbf16>,
    } else {
    }
    return
  }
  func.func @transform_0(%arg0: i32, %arg1: i32) -> (i32, i32) {
    %c0_i32 = arith.constant 0 : i32
    return %arg0, %arg1 : i32, i32
  }
  func.func @transform_1(%arg0: i32, %arg1: i32) -> (i32, i32) {
    %c0_i32 = arith.constant 0 : i32
    %c0_i32_0 = arith.constant 0 : i32
    return %arg1, %c0_i32 : i32, i32
  }
  func.func @transform_2(%arg0: i32, %arg1: i32) -> (i32, i32) {
    %c0_i32 = arith.constant 0 : i32
    %c0_i32_0 = arith.constant 0 : i32
    %c0_i32_1 = arith.constant 0 : i32
    return %c0_i32, %c0_i32_0 : i32, i32
  }
  func.func @transform_3(%arg0: i32, %arg1: i32) -> (i32, i32) {
    %c0_i32 = arith.constant 0 : i32
    %c0_i32_0 = arith.constant 0 : i32
    %c0_i32_1 = arith.constant 0 : i32
    return %c0_i32, %c0_i32_0 : i32, i32
  }
  func.func @transform_4(%arg0: i32, %arg1: i32) -> (i32, i32) {
    %c0_i32 = arith.constant 0 : i32
    %c0_i32_0 = arith.constant 0 : i32
    return %arg0, %c0_i32 : i32, i32
  }
  func.func @transform_5(%arg0: i32, %arg1: i32) -> (i32, i32) {
    %c0_i32 = arith.constant 0 : i32
    %c0_i32_0 = arith.constant 0 : i32
    return %arg0, %c0_i32 : i32, i32
  }
  func.func @transform_6(%arg0: i32, %arg1: i32) -> (i32, i32) {
    %c0_i32 = arith.constant 0 : i32
    %c0_i32_0 = arith.constant 0 : i32
    return %arg0, %c0_i32 : i32, i32
  }
}

module attributes {stable_mosaic.version = 11 : i64} {
  func.func @_layer2_kernel(%arg0: i32, %arg1: i32, %arg2: memref<128x128xi8, #tpu.memory_space<vmem>>, %arg3: memref<128x128xbf16, #tpu.memory_space<vmem>>, %arg4: memref<1x128xf32, #tpu.memory_space<vmem>>, %arg5: memref<128x1xf32, #tpu.memory_space<vmem>>, %arg6: memref<128x128xf32, #tpu.memory_space<vmem>>, %arg7: memref<128x128xf32, #tpu.memory_space<vmem>>) attributes {dimension_semantics = [#tpu.dimension_semantics<parallel>, #tpu.dimension_semantics<arbitrary>], iteration_bounds = array<i64: 1, 1>, scalar_prefetch = 0 : i64, scratch_operands = 1 : i64, tpu.core_type = #tpu.core_type<tc>, window_params = [{transform_indices = @transform_0, window_bounds = array<i64: 128, 128>}, {transform_indices = @transform_1, window_bounds = array<i64: 128, 128>}, {pipeline_mode = #tpu.pipeline_mode<synchronous>, transform_indices = @transform_2, window_bounds = array<i64: 1, 128>}, {transform_indices = @transform_3, window_bounds = array<i64: 128, 1>}, {transform_indices = @transform_4, window_bounds = array<i64: 128, 128>}]} {
    %c0_i32 = arith.constant 0 : i32
    %0 = arith.cmpi eq, %arg1, %c0_i32 : i32
    %1 = arith.extui %0 : i1 to i32
    %c0_i32_0 = arith.constant 0 : i32
    %2 = arith.cmpi ne, %1, %c0_i32_0 : i32
    scf.if %2 {
      %cst_10 = arith.constant 0.000000e+00 : f32
      %13 = vector.broadcast %cst_10 : f32 to vector<128x128xf32>
      %c0_11 = arith.constant 0 : index
      %c0_12 = arith.constant 0 : index
      %14 = vector.load %arg7[%c0_11, %c0_12] : memref<128x128xf32, #tpu.memory_space<vmem>>, vector<128x128xf32>
      tpu.vector_store %arg7[%c0_11, %c0_12], %13 {strides = array<i32>} : memref<128x128xf32, #tpu.memory_space<vmem>>, vector<128x128xf32>,
    } else {
    }
    %c0 = arith.constant 0 : index
    %c0_1 = arith.constant 0 : index
    %3 = vector.load %arg7[%c0, %c0_1] : memref<128x128xf32, #tpu.memory_space<vmem>>, vector<128x128xf32>
    %c0_2 = arith.constant 0 : index
    %c0_3 = arith.constant 0 : index
    %4 = vector.load %arg2[%c0_2, %c0_3] : memref<128x128xi8, #tpu.memory_space<vmem>>, vector<128x128xi8>
    %5 = arith.sitofp %4 : vector<128x128xi8> to vector<128x128xbf16>
    %c0_4 = arith.constant 0 : index
    %c0_5 = arith.constant 0 : index
    %6 = vector.load %arg3[%c0_4, %c0_5] : memref<128x128xbf16, #tpu.memory_space<vmem>>, vector<128x128xbf16>
    %cst = arith.constant dense<0.000000e+00> : vector<128x128xf32>
    %7 = tpu.matmul %5, %6, %cst {dimension_numbers = #tpu.dot_dimension_numbers<[1], [0], [0], [1], [0, 0, 1, 1], [], []>} : vector<128x128xbf16>, vector<128x128xbf16>, vector<128x128xf32> -> vector<128x128xf32>
    %8 = arith.addf %3, %7 : vector<128x128xf32>
    %c0_6 = arith.constant 0 : index
    %c0_7 = arith.constant 0 : index
    %9 = vector.load %arg7[%c0_6, %c0_7] : memref<128x128xf32, #tpu.memory_space<vmem>>, vector<128x128xf32>
    tpu.vector_store %arg7[%c0_6, %c0_7], %8 {strides = array<i32>} : memref<128x128xf32, #tpu.memory_space<vmem>>, vector<128x128xf32>,
    %c0_i32_8 = arith.constant 0 : i32
    %10 = arith.cmpi eq, %arg1, %c0_i32_8 : i32
    %11 = arith.extui %10 : i1 to i32
    %c0_i32_9 = arith.constant 0 : i32
    %12 = arith.cmpi ne, %11, %c0_i32_9 : i32
    scf.if %12 {
      %c0_10 = arith.constant 0 : index
      %c0_11 = arith.constant 0 : index
      %13 = vector.load %arg7[%c0_10, %c0_11] : memref<128x128xf32, #tpu.memory_space<vmem>>, vector<128x128xf32>
      %c0_12 = arith.constant 0 : index
      %c0_13 = arith.constant 0 : index
      %14 = vector.load %arg5[%c0_12, %c0_13] : memref<128x1xf32, #tpu.memory_space<vmem>>, vector<128x1xf32>
      %15 = vector.broadcast %14 : vector<128x1xf32> to vector<128x128xf32>
      %16 = arith.mulf %13, %15 : vector<128x128xf32>
      %c0_14 = arith.constant 0 : index
      %c0_15 = arith.constant 0 : index
      %17 = vector.load %arg4[%c0_14, %c0_15] : memref<1x128xf32, #tpu.memory_space<vmem>>, vector<1x128xf32>
      %18 = vector.broadcast %17 : vector<1x128xf32> to vector<128x128xf32>
      %19 = arith.addf %16, %18 : vector<128x128xf32>
      %20 = tpu.iota {dimensions = array<i32: 1>} : vector<128x128xi32>
      %c16_i32 = arith.constant 16 : i32
      %21 = vector.broadcast %c16_i32 : i32 to vector<128x128xi32>
      %22 = arith.cmpi slt, %20, %21 : vector<128x128xi32>
      %cst_16 = arith.constant 0xFF800000 : f32
      %23 = vector.broadcast %cst_16 : f32 to vector<128x128xf32>
      %24 = arith.select %22, %19, %23 : vector<128x128xi1>, vector<128x128xf32>
      %cst_17 = arith.constant dense<0xFF800000> : vector<128xf32>
      %25 = vector.multi_reduction <maximumf>, %24, %cst_17 [1] : vector<128x128xf32> to vector<128xf32>
      %26 = vector.shape_cast %25 : vector<128xf32> to vector<128x1xf32>
      %27 = vector.broadcast %26 : vector<128x1xf32> to vector<128x128xf32>
      %28 = arith.subf %24, %27 : vector<128x128xf32>
      %29 = math.exp %28 : vector<128x128xf32>
      %cst_18 = arith.constant dense<0.000000e+00> : vector<128xf32>
      %30 = vector.multi_reduction <add>, %29, %cst_18 [1] : vector<128x128xf32> to vector<128xf32>
      %31 = vector.shape_cast %30 : vector<128xf32> to vector<128x1xf32>
      %32 = tpu.reciprocal %31 {approx = true} : vector<128x1xf32> -> vector<128x1xf32>
      %33 = vector.broadcast %32 : vector<128x1xf32> to vector<128x128xf32>
      %34 = arith.mulf %29, %33 : vector<128x128xf32>
      %c0_19 = arith.constant 0 : index
      %c0_20 = arith.constant 0 : index
      %35 = vector.load %arg6[%c0_19, %c0_20] : memref<128x128xf32, #tpu.memory_space<vmem>>, vector<128x128xf32>
      tpu.vector_store %arg6[%c0_19, %c0_20], %34 {strides = array<i32>} : memref<128x128xf32, #tpu.memory_space<vmem>>, vector<128x128xf32>,
    } else {
    }
    return
  }
  func.func @transform_0(%arg0: i32, %arg1: i32) -> (i32, i32) {
    %c0_i32 = arith.constant 0 : i32
    return %arg0, %arg1 : i32, i32
  }
  func.func @transform_1(%arg0: i32, %arg1: i32) -> (i32, i32) {
    %c0_i32 = arith.constant 0 : i32
    %c0_i32_0 = arith.constant 0 : i32
    return %arg1, %c0_i32 : i32, i32
  }
  func.func @transform_2(%arg0: i32, %arg1: i32) -> (i32, i32) {
    %c0_i32 = arith.constant 0 : i32
    %c0_i32_0 = arith.constant 0 : i32
    %c0_i32_1 = arith.constant 0 : i32
    return %c0_i32, %c0_i32_0 : i32, i32
  }
  func.func @transform_3(%arg0: i32, %arg1: i32) -> (i32, i32) {
    %c0_i32 = arith.constant 0 : i32
    %c0_i32_0 = arith.constant 0 : i32
    return %arg0, %c0_i32 : i32, i32
  }
  func.func @transform_4(%arg0: i32, %arg1: i32) -> (i32, i32) {
    %c0_i32 = arith.constant 0 : i32
    %c0_i32_0 = arith.constant 0 : i32
    return %arg0, %c0_i32 : i32, i32
  }
}

</mosaic_0001>

<bundles_post_ra>
// kernel: gae_forward.3
= control target key start
LH: loop header
LB: loop body
LE: loop exit
PB: predicated region body
PF: predicated region fallthrough
CT: control target
= control target key end

     0   :  { %v744_v1 = vmov 0   ;;  %v413_v45 = vlaneseq  ;;  %s1097_s1 = inlined_call_operand.vmem [shape: bf16[128,128], index: 1, kind: input, shape index: {}]   ;;  %s1098_s0 = inlined_call_operand.vmem [shape: s8[128,128], index: 0, kind: input, shape index: {}]   ;;  %s1099_s3 = inlined_call_operand.vmem [shape: f32[128,1], index: 3, kind: input, shape index: {}]   ;;  %s1100_s2 = inlined_call_operand.vmem [shape: f32[1,128], index: 2, kind: input, shape index: {}]   ;;  %s1101_s4 = inlined_call_operand.vmem [shape: f32[128,128], index: 4, kind: output, shape index: {}]  }
   0x1   :  { %v672_v0 = vld [vmem:[%s1097_s1 + $0x38] sm:$0xff]   ;;  %670 = vset.pattern.permute.xlu0 %v744_v1  ;;  %671 = vset.pattern.permute.xlu1 %v744_v1  ;;  %v673_v2 = vld [vmem:[%s1097_s1 + $0x30] sm:$0xff]   ;;  %v674_v3 = vld [vmem:[%s1097_s1 + $0x28] sm:$0xff]  }
   0x2   :  { %621 = vmatprep.subr.bf16.mxu0 %v672_v0  ;;  %653 = vmatprep.subr.bf16.mxu1 %v672_v0  ;;  %v675_v4 = vld [vmem:[%s1097_s1 + $0x20] sm:$0xff]   ;;  %v790_v6 = vld [vmem:[%s1098_s0 + $0x10] sm:$0xff]  ;;  %v279_v11 = vld [vmem:[%s1099_s3 + $0x8] sm:$0xff]  ;;  %v864_v47 = vand.u32 127, %v413_v45 }
   0x3   :  { %622 = vmatpush3.bf16.msra.mxu0 %v672_v0  ;;  %661 = vmatpush3.bf16.msra.mxu1 %v672_v0  ;;  %v785_v5 = vld [vmem:[%s1098_s0] sm:$0xff]  ;;  %v62_v8 = vunpack.c.l.s8.bf16 %v790_v6  ;;  %v280_v10 = vld [vmem:[%s1099_s3 + $0x10] sm:$0xff]  ;;  %v281_v12 = vld [vmem:[%s1099_s3 + $0x18] sm:$0xff]  ;;  %v63_v28 = vunpack.c.h.s8.bf16 %v790_v6 }
   0x4   :  { %623 = vmatprep.subr.bf16.mxu0 %v673_v2  ;;  %654 = vmatprep.subr.bf16.mxu1 %v673_v2  ;;  %v58_v7 = vunpack.c.l.s8.bf16 %v785_v5  ;;  %v278_v9 = vld [vmem:[%s1099_s3] sm:$0xff]  ;;  %v676_v13 = vld [vmem:[%s1097_s1 + $0x18] sm:$0xff]   ;;  %v283_v15 = vld [vmem:[%s1099_s3 + $0x28] sm:$0xff]  ;;  %v59_v27 = vunpack.c.h.s8.bf16 %v785_v5  ;;  %vm415_vm0 = vcmp.lt.s32.totalorder %v864_v47, 16 }
   0x5   :  { %296 = vperm.xlu0 %670, %v278_v9   ;;  %306 = vperm.xlu1 %671, %v280_v10   ;;  %v282_v14 = vld [vmem:[%s1099_s3 + $0x20] sm:$0xff]  ;;  %v677_v16 = vld [vmem:[%s1097_s1 + $0x10] sm:$0xff]   ;;  %v285_v18 = vld [vmem:[%s1099_s3 + $0x38] sm:$0xff] }
   0x6   :  { %637 = vmatprep.mubr.bf16.mxu0 %v58_v7  ;;  %645 = vmatprep.mubr.bf16.mxu1 %v62_v8  ;;  %v284_v17 = vld [vmem:[%s1099_s3 + $0x30] sm:$0xff]  ;;  %v678_v19 = vld [vmem:[%s1097_s1 + $0x8] sm:$0xff]   ;;  %v286_v20 = vld [vmem:[%s1099_s3 + $0x40] sm:$0xff] }
   0x7   :  { %624 = vmatpush3.bf16.msra.mxu0 %v673_v2  ;;  %662 = vmatpush3.bf16.msra.mxu1 %v673_v2  ;;  %v287_v21 = vld [vmem:[%s1099_s3 + $0x48] sm:$0xff]  ;;  %v679_v22 = vld [vmem:[%s1097_s1] sm:$0xff]   ;;  %v288_v23 = vld [vmem:[%s1099_s3 + $0x50] sm:$0xff] }
   0x8   :  { %625 = vmatprep.subr.bf16.mxu0 %v674_v3  ;;  %655 = vmatprep.subr.bf16.mxu1 %v674_v3  ;;  %v289_v24 = vld [vmem:[%s1099_s3 + $0x58] sm:$0xff]  ;;  %v55_v25 = vld [vmem:[%s1098_s0 + $0x8] sm:$0xff]  ;;  %v290_v31 = vld [vmem:[%s1099_s3 + $0x60] sm:$0xff] }
   0x9   :  { %301 = vperm.xlu0 %670, %v279_v11   ;;  %311 = vperm.xlu1 %671, %v281_v12   ;;  %v57_v26 = vld [vmem:[%s1098_s0 + $0x18] sm:$0xff]  ;;  %v60_v29 = vunpack.c.l.s8.bf16 %v55_v25  ;;  %v291_v32 = vld [vmem:[%s1099_s3 + $0x68] sm:$0xff]  ;;  %v292_v33 = vld [vmem:[%s1099_s3 + $0x70] sm:$0xff]  ;;  %v61_v35 = vunpack.c.h.s8.bf16 %v55_v25 }
   0xa   :  { %v64_v30 = vunpack.c.l.s8.bf16 %v57_v26  ;;  %v293_v34 = vld [vmem:[%s1099_s3 + $0x78] sm:$0xff]  ;;  %v65_v36 = vunpack.c.h.s8.bf16 %v57_v26  ;;  %v869_v51 = vld [vmem:[%s1100_s2] ss:$0 sm:$0xff] }
   0xb   :  { %626 = vmatpush3.bf16.msra.mxu0 %v674_v3  ;;  %663 = vmatpush3.bf16.msra.mxu1 %v674_v3 }
   0xc   :  { %627 = vmatprep.subr.bf16.mxu0 %v675_v4  ;;  %656 = vmatprep.subr.bf16.mxu1 %v675_v4 }
   0xd   :  { %316 = vperm.xlu0 %670, %v282_v14   ;;  %321 = vperm.xlu1 %671, %v283_v15  }
   0xf   :  { %628 = vmatpush3.bf16.msra.mxu0 %v675_v4  ;;  %664 = vmatpush3.bf16.msra.mxu1 %v675_v4 }
  0x10   :  { %629 = vmatprep.subr.bf16.mxu0 %v676_v13  ;;  %657 = vmatprep.subr.bf16.mxu1 %v676_v13 }
  0x11   :  { %326 = vperm.xlu0 %670, %v284_v17   ;;  %331 = vperm.xlu1 %671, %v285_v18  }
  0x13   :  { %630 = vmatpush3.bf16.msra.mxu0 %v676_v13  ;;  %665 = vmatpush3.bf16.msra.mxu1 %v676_v13 }
  0x14   :  { %631 = vmatprep.subr.bf16.mxu0 %v677_v16  ;;  %658 = vmatprep.subr.bf16.mxu1 %v677_v16 }
  0x15   :  { %336 = vperm.xlu0 %670, %v286_v20   ;;  %341 = vperm.xlu1 %671, %v287_v21  }
  0x17   :  { %632 = vmatpush3.bf16.msra.mxu0 %v677_v16  ;;  %666 = vmatpush3.bf16.msra.mxu1 %v677_v16 }
  0x18   :  { %633 = vmatprep.subr.bf16.mxu0 %v678_v19  ;;  %659 = vmatprep.subr.bf16.mxu1 %v678_v19 }
  0x19   :  { %346 = vperm.xlu0 %670, %v288_v23   ;;  %351 = vperm.xlu1 %671, %v289_v24  }
  0x1b   :  { %634 = vmatpush3.bf16.msra.mxu0 %v678_v19  ;;  %667 = vmatpush3.bf16.msra.mxu1 %v678_v19 }
  0x1c   :  { %635 = vmatprep.subr.bf16.mxu0 %v679_v22  ;;  %660 = vmatprep.subr.bf16.mxu1 %v679_v22 }
  0x1d   :  { %356 = vperm.xlu0 %670, %v290_v31   ;;  %361 = vperm.xlu1 %671, %v291_v32  }
  0x1f   :  { %636 = vmatpush3.bf16.msra.mxu0 %v679_v22  ;;  %668 = vmatpush3.bf16.msra.mxu1 %v679_v22 }
  0x21   :  { %366 = vperm.xlu0 %670, %v292_v33   ;;  %371 = vperm.xlu1 %671, %v293_v34  }
  0x22   :  { %638 = vmatmul.mubr.bf16.vlgmr.msra.gmra.mxu0 %v59_v27  ;;  %646 = vmatmul.mubr.bf16.vlgmr.msra.gmra.mxu1 %v63_v28 }
  0x23   :  { %641 = vmatprep.mubr.bf16.mxu0 %v60_v29  ;;  %649 = vmatprep.mubr.bf16.mxu1 %v64_v30 }
  0x2a   :  { %642 = vmatmul.mubr.bf16.gmra.mxu0 %v61_v35  ;;  %650 = vmatmul.mubr.bf16.gmra.mxu1 %v65_v36 }
  0x80   :  { %v297_v37 = vpop.permute.xlu0 %296  ;;  %v307_v39 = vpop.permute.xlu1 %306 }
  0x84   :  { %v302_v38 = vpop.permute.xlu0 %301  ;;  %v312_v41 = vpop.permute.xlu1 %311 }
  0x88   :  { %v317_v40 = vpop.permute.xlu0 %316  ;;  %v862_v43 = vpop.permute.xlu1 %321 }
  0x8c   :  { %v327_v42 = vpop.permute.xlu0 %326  ;;  %v332_v46 = vpop.permute.xlu1 %331 }
  0x90   :  { %v337_v44 = vpop.permute.xlu0 %336  ;;  %v342_v52 = vpop.permute.xlu1 %341 }
  0x94   :  { %v347_v48 = vpop.permute.xlu0 %346  ;;  %v352_v6 = vpop.permute.xlu1 %351 }
  0x98   :  { %v357_v19 = vpop.permute.xlu0 %356 }
  0x9c   :  { %v367_v34 = vpop.permute.xlu0 %366 }
  0xe2   :  { %v639_v49 = vpop.f32.mrf.mxu0  ;;  %v647_v50 = vpop.f32.mrf.mxu1 }
  0xe3   :  { %v376_v53 = vmul.f32 %v639_v49, %v307_v39  ;;  %v384_v54 = vmul.f32 %v647_v50, %v347_v48 }
  0xe4   :  { %v164_v55 = vpop.f32.mrf.mxu0  ;;  %v196_v56 = vpop.f32.mrf.mxu1 }
  0xe5   :  { %v374_v57 = vmul.f32 %v297_v37, %v164_v55  ;;  %v382_v58 = vmul.f32 %v337_v44, %v196_v56  ;;  %v407_v59 = vadd.f32 %v869_v51, %v384_v54  ;;  %v399_v60 = vadd.f32 %v869_v51, %v376_v53 }
  0xe6   :  { %v640_v61 = vpop.f32.mrf.mxu0  ;;  %v648_v62 = vpop.f32.mrf.mxu1 }
  0xe7   :  { %v377_v63 = vmul.f32 %v640_v61, %v312_v41  ;;  %v876_v0 = vsel %vm415_vm0, %v407_v59, -inf  ;;  %v880_v1 = vsel %vm415_vm0, %v399_v60, -inf  ;;  %v405_v4 = vadd.f32 %v869_v51, %v382_v58  ;;  %v362_v41 = vpop.permute.xlu1 %361 }
  0xe8   :  { %452 = vmax.xlane.f32.xlu1 %v876_v0  ;;  %v199_v2 = vpop.f32.mrf.mxu1  ;;  %436 = vmax.xlane.f32.xlu0 %v880_v1  ;;  %v167_v3 = vpop.f32.mrf.mxu0  ;;  %v397_v5 = vadd.f32 %v869_v51, %v374_v57  ;;  %v385_v8 = vmul.f32 %v648_v62, %v352_v6 }
  0xe9   :  { %v375_v7 = vmul.f32 %v302_v38, %v167_v3  ;;  %v400_v10 = vadd.f32 %v869_v51, %v377_v63  ;;  %v889_v12 = vsel %vm415_vm0, %v405_v4, -inf  ;;  %v383_v17 = vmul.f32 %v342_v52, %v199_v2 }
  0xea   :  { %v643_v9 = vpop.f32.mrf.mxu0  ;;  %v893_v13 = vsel %vm415_vm0, %v397_v5, -inf  ;;  %v651_v15 = vpop.f32.mrf.mxu1  ;;  %v408_v18 = vadd.f32 %v869_v51, %v385_v8 }
  0xeb   :  { %v380_v11 = vmul.f32 %v643_v9, %v327_v42  ;;  %v398_v14 = vadd.f32 %v869_v51, %v375_v7  ;;  %v901_v21 = vsel %vm415_vm0, %v400_v10, -inf  ;;  %v406_v27 = vadd.f32 %v869_v51, %v383_v17  ;;  %v372_v49 = vpop.permute.xlu1 %371 }
  0xec   :  { %448 = vmax.xlane.f32.xlu1 %v889_v12  ;;  %432 = vmax.xlane.f32.xlu0 %v893_v13  ;;  %v180_v16 = vpop.f32.mrf.mxu0  ;;  %v212_v24 = vpop.f32.mrf.mxu1  ;;  %v912_v26 = vsel %vm415_vm0, %v408_v18, -inf  ;;  %v388_v35 = vmul.f32 %v651_v15, %v367_v34 }
  0xed   :  { %v378_v20 = vmul.f32 %v317_v40, %v180_v16  ;;  %v905_v22 = vsel %vm415_vm0, %v398_v14, -inf  ;;  %v403_v23 = vadd.f32 %v869_v51, %v380_v11  ;;  %v386_v28 = vmul.f32 %v357_v19, %v212_v24 }
  0xee   :  { %v644_v25 = vpop.f32.mrf.mxu0  ;;  %v652_v32 = vpop.f32.mrf.mxu1  ;;  %v924_v36 = vsel %vm415_vm0, %v406_v27, -inf  ;;  %v411_v44 = vadd.f32 %v869_v51, %v388_v35 }
  0xef   :  { %v381_v29 = vmul.f32 %v644_v25, %v332_v46  ;;  %v917_v30 = vsel %vm415_vm0, %v403_v23, -inf  ;;  %v401_v31 = vadd.f32 %v869_v51, %v378_v20  ;;  %v409_v39 = vadd.f32 %v869_v51, %v386_v28 }
  0xf0   :  { %438 = vmax.xlane.f32.xlu0 %v901_v21  ;;  %434 = vmax.xlane.f32.xlu1 %v905_v22  ;;  %v183_v33 = vpop.f32.mrf.mxu0  ;;  %v215_v42 = vpop.f32.mrf.mxu1  ;;  %v389_v50 = vmul.f32 %v652_v32, %v372_v49  ;;  %v949_v52 = vsel %vm415_vm0, %v411_v44, -inf }
  0xf1   :  { %v379_v37 = vmul.f32 %v862_v43, %v183_v33  ;;  %v929_v38 = vsel %vm415_vm0, %v401_v31, -inf  ;;  %v404_v40 = vadd.f32 %v869_v51, %v381_v29  ;;  %v387_v45 = vmul.f32 %v362_v41, %v215_v42 }
  0xf2   :  { %v938_v43 = vsel %vm415_vm0, %v409_v39, -inf  ;;  %v412_v56 = vadd.f32 %v869_v51, %v389_v50 }
  0xf3   :  { %v942_v46 = vsel %vm415_vm0, %v404_v40, -inf  ;;  %v402_v48 = vadd.f32 %v869_v51, %v379_v37  ;;  %v410_v54 = vadd.f32 %v869_v51, %v387_v45 }
  0xf4   :  { %454 = vmax.xlane.f32.xlu0 %v912_v26  ;;  %444 = vmax.xlane.f32.xlu1 %v917_v30  ;;  %v966_v57 = vsel %vm415_vm0, %v412_v56, -inf }
  0xf5   :  { %v953_v53 = vsel %vm415_vm0, %v402_v48, -inf  ;;  %v960_v55 = vsel %vm415_vm0, %v410_v54, -inf }
  0xf8   :  { %450 = vmax.xlane.f32.xlu0 %v924_v36  ;;  %440 = vmax.xlane.f32.xlu1 %v929_v38 }
  0xfc   :  { %456 = vmax.xlane.f32.xlu1 %v938_v43  ;;  %446 = vmax.xlane.f32.xlu0 %v942_v46 }
 0x100   :  { %460 = vmax.xlane.f32.xlu1 %v949_v52  ;;  %442 = vmax.xlane.f32.xlu0 %v953_v53 }
 0x104   :  { %458 = vmax.xlane.f32.xlu0 %v960_v55 }
 0x108   :  { %462 = vmax.xlane.f32.xlu0 %v966_v57 }
 0x171   :  { %v453_v58 = vpop.xlane.xlu1 %452  ;;  %v437_v59 = vpop.xlane.xlu0 %436 }
 0x172   :  { %v466_v60 = vsub.f32 %v880_v1, %v437_v59  ;;  %v474_v61 = vsub.f32 %v876_v0, %v453_v58 }
 0x174   :  { %v484_v62 = vmul.f32 1.442695, %v466_v60  ;;  %v500_v3 = vmul.f32 1.442695, %v474_v61 }
 0x175   :  { %v449_v63 = vpop.xlane.xlu1 %448  ;;  %v433_v2 = vpop.xlane.xlu0 %432 }
 0x176   :  { %680 = vpow2.f32 %v484_v62  ;;  %v464_v51 = vsub.f32 %v893_v13, %v433_v2  ;;  %v472_v6 = vsub.f32 %v889_v12, %v449_v63 }
 0x177   :  { %682 = vpow2.f32 %v500_v3 }
 0x178   :  { %v480_v7 = vmul.f32 1.442695, %v464_v51  ;;  %v496_v11 = vmul.f32 1.442695, %v472_v6 }
 0x179   :  { %v439_v4 = vpop.xlane.xlu0 %438  ;;  %v435_v5 = vpop.xlane.xlu1 %434 }
 0x17a   :  { %v467_v47 = vsub.f32 %v901_v21, %v439_v4  ;;  %v465_v0 = vsub.f32 %v905_v22, %v435_v5 }
 0x17c   :  { %v486_v8 = vmul.f32 1.442695, %v467_v47  ;;  %v482_v17 = vmul.f32 1.442695, %v465_v0 }
 0x17d   :  { %v455_v9 = vpop.xlane.xlu0 %454  ;;  %v445_v1 = vpop.xlane.xlu1 %444 }
 0x17e   :  { %684 = vpow2.f32 %v486_v8  ;;  %v475_v10 = vsub.f32 %v912_v26, %v455_v9  ;;  %v470_v13 = vsub.f32 %v917_v30, %v445_v1 }
 0x17f   :  { %686 = vpow2.f32 %v480_v7 }
 0x180   :  { %v502_v14 = vmul.f32 1.442695, %v475_v10  ;;  %v492_v18 = vmul.f32 1.442695, %v470_v13 }
 0x181   :  { %v451_v15 = vpop.xlane.xlu0 %450  ;;  %v441_v16 = vpop.xlane.xlu1 %440 }
 0x182   :  { %688 = vpow2.f32 %v502_v14  ;;  %v473_v12 = vsub.f32 %v924_v36, %v451_v15  ;;  %v468_v19 = vsub.f32 %v929_v38, %v441_v16 }
 0x183   :  { %690 = vpow2.f32 %v496_v11  ;;  %v979_v20 = vpop.eup %680 }
 0x184   :  { %516 = vadd.xlane.f32.xlu1 %v979_v20  ;;  %692 = vpow2.f32 %v482_v17  ;;  %v498_v23 = vmul.f32 1.442695, %v473_v12  ;;  %v488_v25 = vmul.f32 1.442695, %v468_v19  ;;  %v984_v27 = vpop.eup %682 }
 0x185   :  { %v457_v21 = vpop.xlane.xlu1 %456  ;;  %v447_v22 = vpop.xlane.xlu0 %446  ;;  %694 = vpow2.f32 %v492_v18 }
 0x186   :  { %v471_v24 = vsub.f32 %v942_v46, %v447_v22  ;;  %v476_v26 = vsub.f32 %v938_v43, %v457_v21  ;;  %696 = vpow2.f32 %v498_v23 }
 0x187   :  { %698 = vpow2.f32 %v488_v25 }
 0x188   :  { %532 = vadd.xlane.f32.xlu1 %v984_v27  ;;  %v494_v30 = vmul.f32 1.442695, %v471_v24  ;;  %v504_v33 = vmul.f32 1.442695, %v476_v26 }
 0x189   :  { %v461_v28 = vpop.xlane.xlu1 %460  ;;  %v443_v29 = vpop.xlane.xlu0 %442 }
 0x18a   :  { %v469_v31 = vsub.f32 %v953_v53, %v443_v29  ;;  %v478_v34 = vsub.f32 %v949_v52, %v461_v28  ;;  %700 = vpow2.f32 %v494_v30 }
 0x18b   :  { %v988_v32 = vpop.eup %684  ;;  %702 = vpow2.f32 %v504_v33 }
 0x18c   :  { %v991_v35 = vpop.eup %686  ;;  %518 = vadd.xlane.f32.xlu0 %v988_v32  ;;  %v490_v37 = vmul.f32 1.442695, %v469_v31  ;;  %v508_v40 = vmul.f32 1.442695, %v478_v34 }
 0x18d   :  { %512 = vadd.xlane.f32.xlu1 %v991_v35  ;;  %v459_v36 = vpop.xlane.xlu0 %458 }
 0x18e   :  { %v477_v38 = vsub.f32 %v960_v55, %v459_v36  ;;  %704 = vpow2.f32 %v490_v37 }
 0x18f   :  { %v996_v39 = vpop.eup %688  ;;  %706 = vpow2.f32 %v508_v40 }
 0x190   :  { %v998_v41 = vpop.eup %690  ;;  %534 = vadd.xlane.f32.xlu0 %v996_v39  ;;  %v506_v44 = vmul.f32 1.442695, %v477_v38 }
 0x191   :  { %528 = vadd.xlane.f32.xlu1 %v998_v41  ;;  %v463_v42 = vpop.xlane.xlu0 %462  ;;  %v1003_v43 = vpop.eup %692 }
 0x192   :  { %v479_v45 = vsub.f32 %v966_v57, %v463_v42  ;;  %v1005_v46 = vpop.eup %694  ;;  %708 = vpow2.f32 %v506_v44 }
 0x193   :  { %v1009_v49 = vpop.eup %696 }
 0x194   :  { %514 = vadd.xlane.f32.xlu0 %v1003_v43  ;;  %v510_v48 = vmul.f32 1.442695, %v479_v45  ;;  %v1011_v50 = vpop.eup %698 }
 0x195   :  { %524 = vadd.xlane.f32.xlu1 %v1005_v46 }
 0x196   :  { %710 = vpow2.f32 %v510_v48 }
 0x197   :  { %v1015_v52 = vpop.eup %700 }
 0x198   :  { %530 = vadd.xlane.f32.xlu0 %v1009_v49  ;;  %v1017_v53 = vpop.eup %702 }
 0x199   :  { %520 = vadd.xlane.f32.xlu1 %v1011_v50 }
 0x19b   :  { %v1021_v54 = vpop.eup %704 }
 0x19c   :  { %526 = vadd.xlane.f32.xlu0 %v1015_v52  ;;  %v1023_v55 = vpop.eup %706 }
 0x19d   :  { %536 = vadd.xlane.f32.xlu1 %v1017_v53 }
 0x19f   :  { %v1027_v56 = vpop.eup %708 }
 0x1a0   :  { %522 = vadd.xlane.f32.xlu0 %v1021_v54 }
 0x1a1   :  { %540 = vadd.xlane.f32.xlu1 %v1023_v55 }
 0x1a3   :  { %v1030_v57 = vpop.eup %710 }
 0x1a4   :  { %538 = vadd.xlane.f32.xlu0 %v1027_v56 }
 0x1a8   :  { %542 = vadd.xlane.f32.xlu0 %v1030_v57 }
 0x20d   :  { %v517_v58 = vpop.xlane.xlu1 %516 }
 0x20e   :  { %712 = vrcp.f32 %v517_v58 }
 0x211   :  { %v533_v59 = vpop.xlane.xlu1 %532 }
 0x212   :  { %714 = vrcp.f32 %v533_v59 }
 0x215   :  { %v519_v60 = vpop.xlane.xlu0 %518 }
 0x216   :  { %v513_v61 = vpop.xlane.xlu1 %512  ;;  %716 = vrcp.f32 %v519_v60 }
 0x217   :  { %718 = vrcp.f32 %v513_v61 }
 0x219   :  { %v535_v62 = vpop.xlane.xlu0 %534 }
 0x21a   :  { %v529_v63 = vpop.xlane.xlu1 %528  ;;  %720 = vrcp.f32 %v535_v62 }
 0x21b   :  { %722 = vrcp.f32 %v529_v63  ;;  %v713_v2 = vpop.eup %712 }
 0x21c   :  { %v562_v3 = vmul.f32 %v713_v2, %v979_v20 }
 0x21d   :  { %v515_v51 = vpop.xlane.xlu0 %514 }
 0x21e   :  { %v525_v4 = vpop.xlane.xlu1 %524  ;;  %724 = vrcp.f32 %v515_v51  ;;  %578 = vst [vmem:[%s1101_s4 + $0x10] sm:$0xff] %v562_v3 }
 0x21f   :  { %726 = vrcp.f32 %v525_v4  ;;  %v715_v5 = vpop.eup %714 }
 0x220   :  { %v570_v47 = vmul.f32 %v715_v5, %v984_v27 }
 0x221   :  { %v531_v6 = vpop.xlane.xlu0 %530 }
 0x222   :  { %v521_v7 = vpop.xlane.xlu1 %520  ;;  %728 = vrcp.f32 %v531_v6  ;;  %586 = vst [vmem:[%s1101_s4 + $0x50] sm:$0xff] %v570_v47 }
 0x223   :  { %v717_v8 = vpop.eup %716  ;;  %730 = vrcp.f32 %v521_v7 }
 0x224   :  { %v719_v9 = vpop.eup %718  ;;  %v563_v1 = vmul.f32 %v717_v8, %v988_v32 }
 0x225   :  { %v560_v0 = vmul.f32 %v719_v9, %v991_v35  ;;  %v527_v10 = vpop.xlane.xlu0 %526 }
 0x226   :  { %579 = vst [vmem:[%s1101_s4 + $0x18] sm:$0xff] %v563_v1  ;;  %v537_v11 = vpop.xlane.xlu1 %536  ;;  %732 = vrcp.f32 %v527_v10 }
 0x227   :  { %v721_v13 = vpop.eup %720  ;;  %576 = vst [vmem:[%s1101_s4] sm:$0xff] %v560_v0  ;;  %734 = vrcp.f32 %v537_v11 }
 0x228   :  { %v723_v14 = vpop.eup %722  ;;  %v571_v15 = vmul.f32 %v721_v13, %v996_v39 }
 0x229   :  { %v568_v16 = vmul.f32 %v723_v14, %v998_v41  ;;  %v523_v17 = vpop.xlane.xlu0 %522 }
 0x22a   :  { %587 = vst [vmem:[%s1101_s4 + $0x58] sm:$0xff] %v571_v15  ;;  %v541_v12 = vpop.xlane.xlu1 %540  ;;  %736 = vrcp.f32 %v523_v17 }
 0x22b   :  { %v725_v18 = vpop.eup %724  ;;  %584 = vst [vmem:[%s1101_s4 + $0x40] sm:$0xff] %v568_v16  ;;  %738 = vrcp.f32 %v541_v12 }
 0x22c   :  { %v727_v19 = vpop.eup %726  ;;  %v561_v20 = vmul.f32 %v725_v18, %v1003_v43 }
 0x22d   :  { %v566_v21 = vmul.f32 %v727_v19, %v1005_v46  ;;  %v539_v22 = vpop.xlane.xlu0 %538 }
 0x22e   :  { %577 = vst [vmem:[%s1101_s4 + $0x8] sm:$0xff] %v561_v20  ;;  %740 = vrcp.f32 %v539_v22 }
 0x22f   :  { %v729_v23 = vpop.eup %728  ;;  %582 = vst [vmem:[%s1101_s4 + $0x30] sm:$0xff] %v566_v21 }
 0x230   :  { %v731_v24 = vpop.eup %730  ;;  %v569_v25 = vmul.f32 %v729_v23, %v1009_v49 }
 0x231   :  { %v564_v26 = vmul.f32 %v731_v24, %v1011_v50  ;;  %v543_v27 = vpop.xlane.xlu0 %542 }
 0x232   :  { %585 = vst [vmem:[%s1101_s4 + $0x48] sm:$0xff] %v569_v25  ;;  %742 = vrcp.f32 %v543_v27 }
 0x233   :  { %v733_v28 = vpop.eup %732  ;;  %580 = vst [vmem:[%s1101_s4 + $0x20] sm:$0xff] %v564_v26 }
 0x234   :  { %v735_v29 = vpop.eup %734  ;;  %v567_v30 = vmul.f32 %v733_v28, %v1015_v52 }
 0x235   :  { %v572_v31 = vmul.f32 %v735_v29, %v1017_v53 }
 0x236   :  { %583 = vst [vmem:[%s1101_s4 + $0x38] sm:$0xff] %v567_v30 }
 0x237   :  { %v737_v32 = vpop.eup %736  ;;  %588 = vst [vmem:[%s1101_s4 + $0x60] sm:$0xff] %v572_v31 }
 0x238   :  { %v739_v33 = vpop.eup %738  ;;  %v565_v34 = vmul.f32 %v737_v32, %v1021_v54 }
 0x239   :  { %v574_v35 = vmul.f32 %v739_v33, %v1023_v55 }
 0x23a   :  { %581 = vst [vmem:[%s1101_s4 + $0x28] sm:$0xff] %v565_v34 }
 0x23b   :  { %v741_v36 = vpop.eup %740  ;;  %590 = vst [vmem:[%s1101_s4 + $0x70] sm:$0xff] %v574_v35 }
 0x23c   :  { %v573_v37 = vmul.f32 %v741_v36, %v1027_v56 }
 0x23e   :  { %589 = vst [vmem:[%s1101_s4 + $0x68] sm:$0xff] %v573_v37 }
 0x23f   :  { %v743_v38 = vpop.eup %742 }
 0x240   :  { %v575_v39 = vmul.f32 %v743_v38, %v1030_v57 }
 0x242   :  { %591 = vst [vmem:[%s1101_s4 + $0x78] sm:$0xff] %v575_v39 }

// kernel: gae_forward.2
= control target key start
LH: loop header
LB: loop body
LE: loop exit
PB: predicated region body
PF: predicated region fallthrough
CT: control target
= control target key end

     0   :  { %v1002_v1 = vmov 0   ;;  %s1279_s1 = inlined_call_operand.vmem [shape: bf16[128,128], index: 1, kind: input, shape index: {}]   ;;  %s1280_s0 = inlined_call_operand.vmem [shape: s8[128,128], index: 0, kind: input, shape index: {}]   ;;  %s1281_s5 = inlined_call_operand.vmem [shape: f32[128,1], index: 5, kind: input, shape index: {}]   ;;  %s1282_s3 = inlined_call_operand.vmem [shape: bf16[128,128], index: 3, kind: input, shape index: {}]   ;;  %s1283_s2 = inlined_call_operand.vmem [shape: f32[1,128], index: 2, kind: input, shape index: {}]   ;;  %s1284_s4 = inlined_call_operand.vmem [shape: bf16[128,128], index: 4, kind: input, shape index: {}]   ;;  %s1285_s6 = inlined_call_operand.vmem [shape: bf16[128,128], index: 6, kind: output, shape index: {}]  }
   0x1   :  { %v986_v0 = vld [vmem:[%s1279_s1 + $0x38] sm:$0xff]   ;;  %984 = vset.pattern.permute.xlu0 %v1002_v1  ;;  %985 = vset.pattern.permute.xlu1 %v1002_v1  ;;  %v987_v2 = vld [vmem:[%s1279_s1 + $0x30] sm:$0xff]   ;;  %v988_v3 = vld [vmem:[%s1279_s1 + $0x28] sm:$0xff]  }
   0x2   :  { %919 = vmatprep.subr.bf16.mxu0 %v986_v0  ;;  %v989_v4 = vld [vmem:[%s1279_s1 + $0x20] sm:$0xff]   ;;  %v286_v8 = vld [vmem:[%s1281_s5 + $0x10] sm:$0xff]  ;;  %v285_v9 = vld [vmem:[%s1281_s5 + $0x8] sm:$0xff] }
   0x3   :  { %920 = vmatpush3.bf16.msra.mxu0 %v986_v0  ;;  %v60_v5 = vld [vmem:[%s1280_s0] sm:$0xff]  ;;  %312 = vperm.xlu1 %985, %v286_v8   ;;  %v287_v10 = vld [vmem:[%s1281_s5 + $0x18] sm:$0xff]  ;;  %v289_v13 = vld [vmem:[%s1281_s5 + $0x28] sm:$0xff] }
   0x4   :  { %921 = vmatprep.subr.bf16.mxu0 %v987_v2  ;;  %v64_v6 = vunpack.c.l.s8.bf16 %v60_v5  ;;  %v284_v7 = vld [vmem:[%s1281_s5] sm:$0xff]  ;;  %v990_v11 = vld [vmem:[%s1279_s1 + $0x18] sm:$0xff]   ;;  %v991_v14 = vld [vmem:[%s1279_s1 + $0x10] sm:$0xff]   ;;  %v65_v28 = vunpack.c.h.s8.bf16 %v60_v5 }
   0x5   :  { %302 = vperm.xlu0 %984, %v284_v7   ;;  %v288_v12 = vld [vmem:[%s1281_s5 + $0x20] sm:$0xff]  ;;  %v290_v15 = vld [vmem:[%s1281_s5 + $0x30] sm:$0xff]  ;;  %v291_v16 = vld [vmem:[%s1281_s5 + $0x38] sm:$0xff] }
   0x6   :  { %935 = vmatprep.mubr.bf16.mxu0 %v64_v6  ;;  %v992_v17 = vld [vmem:[%s1279_s1 + $0x8] sm:$0xff]   ;;  %v994_v18 = vld [vmem:[%s1282_s3 + $0x38] sm:$0xff]   ;;  %v292_v19 = vld [vmem:[%s1281_s5 + $0x40] sm:$0xff] }
   0x7   :  { %922 = vmatpush3.bf16.msra.mxu0 %v987_v2  ;;  %317 = vperm.xlu1 %985, %v287_v10   ;;  %v293_v20 = vld [vmem:[%s1281_s5 + $0x48] sm:$0xff]  ;;  %v995_v21 = vld [vmem:[%s1282_s3 + $0x30] sm:$0xff]   ;;  %v993_v22 = vld [vmem:[%s1279_s1] sm:$0xff]  }
   0x8   :  { %923 = vmatprep.subr.bf16.mxu0 %v988_v3  ;;  %951 = vmatprep.subr.bf16.mxu1 %v994_v18  ;;  %v996_v23 = vld [vmem:[%s1282_s3 + $0x28] sm:$0xff]   ;;  %v294_v24 = vld [vmem:[%s1281_s5 + $0x50] sm:$0xff]  ;;  %v295_v25 = vld [vmem:[%s1281_s5 + $0x58] sm:$0xff] }
   0x9   :  { %307 = vperm.xlu0 %984, %v285_v9   ;;  %952 = vmatpush3.bf16.msra.mxu1 %v994_v18  ;;  %v61_v26 = vld [vmem:[%s1280_s0 + $0x8] sm:$0xff]  ;;  %v997_v27 = vld [vmem:[%s1282_s3 + $0x20] sm:$0xff]   ;;  %v298_v32 = vld [vmem:[%s1281_s5 + $0x70] sm:$0xff] }
   0xa   :  { %953 = vmatprep.subr.bf16.mxu1 %v995_v21  ;;  %v66_v29 = vunpack.c.l.s8.bf16 %v61_v26  ;;  %v296_v30 = vld [vmem:[%s1281_s5 + $0x60] sm:$0xff]  ;;  %v297_v31 = vld [vmem:[%s1281_s5 + $0x68] sm:$0xff]  ;;  %v62_v33 = vld [vmem:[%s1280_s0 + $0x10] sm:$0xff]  ;;  %v67_v35 = vunpack.c.h.s8.bf16 %v61_v26 }
   0xb   :  { %924 = vmatpush3.bf16.msra.mxu0 %v988_v3  ;;  %327 = vperm.xlu1 %985, %v289_v13   ;;  %v299_v34 = vld [vmem:[%s1281_s5 + $0x78] sm:$0xff]  ;;  %v68_v36 = vunpack.c.l.s8.bf16 %v62_v33  ;;  %v69_v38 = vunpack.c.h.s8.bf16 %v62_v33  ;;  %v999_v42 = vld [vmem:[%s1282_s3 + $0x10] sm:$0xff]   ;;  %v1000_v43 = vld [vmem:[%s1282_s3 + $0x8] sm:$0xff]  }
   0xc   :  { %925 = vmatprep.subr.bf16.mxu0 %v989_v4  ;;  %v63_v37 = vld [vmem:[%s1280_s0 + $0x18] sm:$0xff]  ;;  %v1001_v44 = vld [vmem:[%s1282_s3] sm:$0xff]   ;;  %v873_v63 = vld [vmem:[%s1284_s4 + $0x8] sm:$0xff]  }
   0xd   :  { %322 = vperm.xlu0 %984, %v288_v12   ;;  %954 = vmatpush3.bf16.msra.mxu1 %v995_v21  ;;  %v70_v39 = vunpack.c.l.s8.bf16 %v63_v37  ;;  %v71_v40 = vunpack.c.h.s8.bf16 %v63_v37  ;;  %v998_v41 = vld [vmem:[%s1282_s3 + $0x18] sm:$0xff]   ;;  %v1167_v57 = vld [vmem:[%s1283_s2] ss:$0 sm:$0xff]  ;;  %v808_v6 = vunpack.c.h.bf16 %v873_v63  ;;  %v807_v10 = vunpack.c.l.bf16 %v873_v63 }
   0xe   :  { %955 = vmatprep.subr.bf16.mxu1 %v996_v23  ;;  %v802_v2 = vld [vmem:[%s1284_s4] sm:$0xff]  }
   0xf   :  { %926 = vmatpush3.bf16.msra.mxu0 %v989_v4  ;;  %337 = vperm.xlu1 %985, %v291_v16   ;;  %v804_v8 = vunpack.c.h.bf16 %v802_v2  ;;  %v803_v13 = vunpack.c.l.bf16 %v802_v2 }
  0x10   :  { %927 = vmatprep.subr.bf16.mxu0 %v990_v11 }
  0x11   :  { %332 = vperm.xlu0 %984, %v290_v15   ;;  %956 = vmatpush3.bf16.msra.mxu1 %v996_v23 }
  0x12   :  { %957 = vmatprep.subr.bf16.mxu1 %v997_v27 }
  0x13   :  { %928 = vmatpush3.bf16.msra.mxu0 %v990_v11  ;;  %347 = vperm.xlu1 %985, %v293_v20  }
  0x14   :  { %929 = vmatprep.subr.bf16.mxu0 %v991_v14 }
  0x15   :  { %342 = vperm.xlu0 %984, %v292_v19   ;;  %958 = vmatpush3.bf16.msra.mxu1 %v997_v27 }
  0x16   :  { %959 = vmatprep.subr.bf16.mxu1 %v998_v41 }
  0x17   :  { %930 = vmatpush3.bf16.msra.mxu0 %v991_v14  ;;  %357 = vperm.xlu1 %985, %v295_v25  }
  0x18   :  { %931 = vmatprep.subr.bf16.mxu0 %v992_v17 }
  0x19   :  { %352 = vperm.xlu0 %984, %v294_v24   ;;  %960 = vmatpush3.bf16.msra.mxu1 %v998_v41 }
  0x1a   :  { %961 = vmatprep.subr.bf16.mxu1 %v999_v42 }
  0x1b   :  { %932 = vmatpush3.bf16.msra.mxu0 %v992_v17  ;;  %367 = vperm.xlu1 %985, %v297_v31  }
  0x1c   :  { %933 = vmatprep.subr.bf16.mxu0 %v993_v22 }
  0x1d   :  { %362 = vperm.xlu0 %984, %v296_v30   ;;  %962 = vmatpush3.bf16.msra.mxu1 %v999_v42 }
  0x1e   :  { %963 = vmatprep.subr.bf16.mxu1 %v1000_v43 }
  0x1f   :  { %934 = vmatpush3.bf16.msra.mxu0 %v993_v22  ;;  %377 = vperm.xlu1 %985, %v299_v34  }
  0x21   :  { %372 = vperm.xlu0 %984, %v298_v32   ;;  %964 = vmatpush3.bf16.msra.mxu1 %v1000_v43 }
  0x22   :  { %936 = vmatmul.mubr.bf16.vlgmr.msra.gmra.mxu0 %v65_v28  ;;  %965 = vmatprep.subr.bf16.mxu1 %v1001_v44  ;;  %v875_v28 = vld [vmem:[%s1284_s4 + $0x18] sm:$0xff]  }
  0x23   :  { %939 = vmatprep.mubr.bf16.mxu0 %v66_v29  ;;  %v874_v29 = vld [vmem:[%s1284_s4 + $0x10] sm:$0xff]   ;;  %v816_v33 = vunpack.c.h.bf16 %v875_v28 }
  0x24   :  { %v811_v42 = vunpack.c.l.bf16 %v874_v29 }
  0x25   :  { %966 = vmatpush3.bf16.msra.mxu1 %v1001_v44 }
  0x2a   :  { %940 = vmatmul.mubr.bf16.gmra.mxu0 %v67_v35 }
  0x2b   :  { %943 = vmatprep.mubr.bf16.mxu0 %v68_v36 }
  0x32   :  { %944 = vmatmul.mubr.bf16.gmra.mxu0 %v69_v38  ;;  %v812_v38 = vunpack.c.h.bf16 %v874_v29 }
  0x33   :  { %947 = vmatprep.mubr.bf16.mxu0 %v70_v39 }
  0x3a   :  { %948 = vmatmul.mubr.bf16.gmra.mxu0 %v71_v40  ;;  %v815_v40 = vunpack.c.l.bf16 %v875_v28 }
  0x7e   :  { %v1148_v46 = vpop.permute.xlu1 %312 }
  0x80   :  { %v1146_v45 = vpop.permute.xlu0 %302 }
  0x82   :  { %v1152_v48 = vpop.permute.xlu1 %317 }
  0x84   :  { %v1150_v47 = vpop.permute.xlu0 %307 }
  0x86   :  { %v1156_v50 = vpop.permute.xlu1 %327 }
  0x88   :  { %v1154_v49 = vpop.permute.xlu0 %322 }
  0x8a   :  { %v1162_v56 = vpop.permute.xlu1 %337 }
  0x8c   :  { %v1158_v52 = vpop.permute.xlu0 %332 }
  0x8e   :  { %v1183_v9 = vpop.permute.xlu1 %347 }
  0x90   :  { %v1180_v3 = vpop.permute.xlu0 %342 }
  0x92   :  { %v1200_v32 = vpop.permute.xlu1 %357 }
  0x94   :  { %v1188_v22 = vpop.permute.xlu0 %352 }
  0xe2   :  { %v937_v51 = vpop.f32.mrf.mxu0 }
  0xe3   :  { %v382_v54 = vmul.f32 %v937_v51, %v1148_v46 }
  0xe4   :  { %v170_v53 = vpop.f32.mrf.mxu0 }
  0xe5   :  { %v380_v55 = vmul.f32 %v1146_v45, %v170_v53  ;;  %v405_v62 = vadd.f32 %v1167_v57, %v382_v54 }
  0xe6   :  { %v938_v58 = vpop.f32.mrf.mxu0 }
  0xe7   :  { %v383_v59 = vmul.f32 %v938_v58, %v1152_v48  ;;  %v403_v60 = vadd.f32 %v1167_v57, %v380_v55  ;;  %v421_v14 = vmax.f32 %v405_v62, 0.0  ;;  %v1205_v55 = vpop.permute.xlu0 %362  ;;  %v1208_v62 = vpop.permute.xlu1 %367 }
  0xe8   :  { %v173_v61 = vpop.f32.mrf.mxu0 }
  0xe9   :  { %v406_v0 = vadd.f32 %v1167_v57, %v383_v59  ;;  %v381_v1 = vmul.f32 %v1150_v47, %v173_v61  ;;  %v419_v11 = vmax.f32 %v403_v60, 0.0  ;;  %v469_v26 = vmul.f32 %v807_v10, %v421_v14 }
  0xea   :  { %v941_v4 = vpop.f32.mrf.mxu0 }
  0xeb   :  { %v422_v5 = vmax.f32 %v406_v0, 0.0  ;;  %v404_v7 = vadd.f32 %v1167_v57, %v381_v1  ;;  %v386_v16 = vmul.f32 %v941_v4, %v1158_v52  ;;  %v467_v25 = vmul.f32 %v803_v13, %v419_v11 }
  0xec   :  { %v186_v12 = vpop.f32.mrf.mxu0 }
  0xed   :  { %v420_v15 = vmax.f32 %v404_v7, 0.0  ;;  %v384_v17 = vmul.f32 %v1154_v49, %v186_v12  ;;  %v470_v19 = vmul.f32 %v808_v6, %v422_v5  ;;  %v409_v27 = vadd.f32 %v1167_v57, %v386_v16  ;;  %v877_v5 = vld [vmem:[%s1284_s4 + $0x28] sm:$0xff]   ;;  %v876_v6 = vld [vmem:[%s1284_s4 + $0x20] sm:$0xff]  }
  0xee   :  { %v942_v18 = vpop.f32.mrf.mxu0  ;;  %v824_v10 = vunpack.c.h.bf16 %v877_v5 }
  0xef   :  { %v387_v20 = vmul.f32 %v942_v18, %v1162_v56  ;;  %v468_v21 = vmul.f32 %v804_v8, %v420_v15  ;;  %v407_v23 = vadd.f32 %v1167_v57, %v384_v17  ;;  %v484_v39 = vpack.c.bf16 %v470_v19, %v469_v26  ;;  %v1221_v17 = vpop.permute.xlu0 %372 }
  0xf0   :  { %v189_v24 = vpop.f32.mrf.mxu0  ;;  %v425_v44 = vmax.f32 %v409_v27, 0.0  ;;  %v820_v15 = vunpack.c.h.bf16 %v876_v6  ;;  %v823_v18 = vunpack.c.l.bf16 %v877_v5  ;;  %v1225_v27 = vpop.permute.xlu1 %377 }
  0xf1   :  { %v410_v30 = vadd.f32 %v1167_v57, %v387_v20  ;;  %v385_v31 = vmul.f32 %v1156_v50, %v189_v24  ;;  %v483_v35 = vpack.c.bf16 %v468_v21, %v467_v25  ;;  %v423_v41 = vmax.f32 %v407_v23, 0.0 }
  0xf2   :  { %v945_v34 = vpop.f32.mrf.mxu0  ;;  %v473_v2 = vmul.f32 %v815_v40, %v425_v44  ;;  %v819_v20 = vunpack.c.l.bf16 %v876_v6 }
  0xf3   :  { %v426_v36 = vmax.f32 %v410_v30, 0.0  ;;  %v408_v37 = vadd.f32 %v1167_v57, %v385_v31  ;;  %967 = vmatprep.mubr.bf16.mxu1 %v483_v35  ;;  %v390_v53 = vmul.f32 %v945_v34, %v1188_v22  ;;  %v471_v63 = vmul.f32 %v811_v42, %v423_v41 }
  0xf4   :  { %v202_v43 = vpop.f32.mrf.mxu0  ;;  %968 = vmatmul.mubr.bf16.vlgmr.msra.gmra.mxu1 %v484_v39  ;;  %v879_v39 = vld [vmem:[%s1284_s4 + $0x38] sm:$0xff]  }
  0xf5   :  { %v424_v51 = vmax.f32 %v408_v37, 0.0  ;;  %v388_v54 = vmul.f32 %v1180_v3, %v202_v43  ;;  %v474_v59 = vmul.f32 %v816_v33, %v426_v36  ;;  %v413_v4 = vadd.f32 %v1167_v57, %v390_v53  ;;  %v878_v33 = vld [vmem:[%s1284_s4 + $0x30] sm:$0xff]  }
  0xf6   :  { %v946_v58 = vpop.f32.mrf.mxu0  ;;  %v827_v42 = vunpack.c.l.bf16 %v878_v33  ;;  %v832_v43 = vunpack.c.h.bf16 %v879_v39  ;;  %v828_v44 = vunpack.c.h.bf16 %v878_v33 }
  0xf7   :  { %v472_v60 = vmul.f32 %v812_v38, %v424_v51  ;;  %v391_v61 = vmul.f32 %v946_v58, %v1200_v32  ;;  %v411_v0 = vadd.f32 %v1167_v57, %v388_v54  ;;  %v486_v16 = vpack.c.bf16 %v474_v59, %v473_v2 }
  0xf8   :  { %v205_v1 = vpop.f32.mrf.mxu0  ;;  %v429_v23 = vmax.f32 %v413_v4, 0.0 }
  0xf9   :  { %v414_v7 = vadd.f32 %v1167_v57, %v391_v61  ;;  %v389_v8 = vmul.f32 %v1183_v9, %v205_v1  ;;  %v485_v12 = vpack.c.bf16 %v472_v60, %v471_v63  ;;  %v427_v19 = vmax.f32 %v411_v0, 0.0 }
  0xfa   :  { %v949_v11 = vpop.f32.mrf.mxu0  ;;  %v477_v37 = vmul.f32 %v823_v18, %v429_v23  ;;  %v831_v61 = vunpack.c.l.bf16 %v879_v39 }
  0xfb   :  { %v430_v13 = vmax.f32 %v414_v7, 0.0  ;;  %v412_v14 = vadd.f32 %v1167_v57, %v389_v8  ;;  %971 = vmatprep.mubr.bf16.mxu1 %v485_v12  ;;  %v394_v25 = vmul.f32 %v949_v11, %v1221_v17  ;;  %v475_v35 = vmul.f32 %v819_v20, %v427_v19 }
  0xfc   :  { %v218_v21 = vpop.f32.mrf.mxu0  ;;  %972 = vmatmul.mubr.bf16.gmra.mxu1 %v486_v16 }
  0xfd   :  { %v428_v24 = vmax.f32 %v412_v14, 0.0  ;;  %v392_v26 = vmul.f32 %v1205_v55, %v218_v21  ;;  %v478_v29 = vmul.f32 %v824_v10, %v430_v13  ;;  %v417_v38 = vadd.f32 %v1167_v57, %v394_v25 }
  0xfe   :  { %v950_v28 = vpop.f32.mrf.mxu0 }
  0xff   :  { %v476_v30 = vmul.f32 %v820_v15, %v428_v24  ;;  %v415_v31 = vadd.f32 %v1167_v57, %v392_v26  ;;  %v395_v34 = vmul.f32 %v950_v28, %v1225_v27  ;;  %v488_v59 = vpack.c.bf16 %v478_v29, %v477_v37 }
 0x100   :  { %v221_v36 = vpop.f32.mrf.mxu0  ;;  %v433_v60 = vmax.f32 %v417_v38, 0.0 }
 0x101   :  { %v418_v40 = vadd.f32 %v1167_v57, %v395_v34  ;;  %v393_v41 = vmul.f32 %v1208_v62, %v221_v36  ;;  %v487_v51 = vpack.c.bf16 %v476_v30, %v475_v35  ;;  %v431_v53 = vmax.f32 %v415_v31, 0.0 }
 0x102   :  { %v481_v4 = vmul.f32 %v831_v61, %v433_v60 }
 0x103   :  { %v434_v54 = vmax.f32 %v418_v40, 0.0  ;;  %v416_v58 = vadd.f32 %v1167_v57, %v393_v41  ;;  %975 = vmatprep.mubr.bf16.mxu1 %v487_v51  ;;  %v479_v0 = vmul.f32 %v827_v42, %v431_v53 }
 0x104   :  { %976 = vmatmul.mubr.bf16.gmra.mxu1 %v488_v59 }
 0x105   :  { %v432_v63 = vmax.f32 %v416_v58, 0.0  ;;  %v482_v1 = vmul.f32 %v832_v43, %v434_v54 }
 0x107   :  { %v480_v2 = vmul.f32 %v828_v44, %v432_v63  ;;  %v490_v6 = vpack.c.bf16 %v482_v1, %v481_v4 }
 0x109   :  { %v489_v5 = vpack.c.bf16 %v480_v2, %v479_v0 }
 0x10b   :  { %979 = vmatprep.mubr.bf16.mxu1 %v489_v5 }
 0x10c   :  { %980 = vmatmul.mubr.bf16.gmra.mxu1 %v490_v6 }
 0x1b4   :  { %v969_v7 = vpop.f32.mrf.mxu1 }
 0x1b5   :  { %v654_v11 = vmul.f32 %v969_v7, %v1148_v46 }
 0x1b6   :  { %v589_v8 = vpop.f32.mrf.mxu1 }
 0x1b7   :  { %v652_v13 = vmul.f32 %v589_v8, %v1146_v45 }
 0x1b8   :  { %v970_v10 = vpop.f32.mrf.mxu1 }
 0x1b9   :  { %v655_v57 = vmul.f32 %v970_v10, %v1152_v48 }
 0x1ba   :  { %v592_v12 = vpop.f32.mrf.mxu1 }
 0x1bb   :  { %v841_v14 = vpack.c.bf16 %v655_v57, %v654_v11  ;;  %v653_v15 = vmul.f32 %v592_v12, %v1150_v47 }
 0x1bc   :  { %v973_v16 = vpop.f32.mrf.mxu1 }
 0x1bd   :  { %880 = vst [vmem:[%s1285_s6 + $0x8] sm:$0xff] %v841_v14   ;;  %v836_v18 = vpack.c.bf16 %v653_v15, %v652_v13  ;;  %v658_v48 = vmul.f32 %v973_v16, %v1158_v52 }
 0x1be   :  { %v605_v19 = vpop.f32.mrf.mxu1 }
 0x1bf   :  { %837 = vst [vmem:[%s1285_s6] sm:$0xff] %v836_v18   ;;  %v656_v21 = vmul.f32 %v605_v19, %v1154_v49 }
 0x1c0   :  { %v974_v46 = vpop.f32.mrf.mxu1 }
 0x1c1   :  { %v659_v20 = vmul.f32 %v974_v46, %v1162_v56 }
 0x1c2   :  { %v608_v45 = vpop.f32.mrf.mxu1 }
 0x1c3   :  { %v851_v47 = vpack.c.bf16 %v659_v20, %v658_v48  ;;  %v657_v23 = vmul.f32 %v608_v45, %v1156_v50 }
 0x1c4   :  { %v977_v24 = vpop.f32.mrf.mxu1 }
 0x1c5   :  { %882 = vst [vmem:[%s1285_s6 + $0x18] sm:$0xff] %v851_v47   ;;  %v846_v25 = vpack.c.bf16 %v657_v23, %v656_v21  ;;  %v662_v56 = vmul.f32 %v977_v24, %v1188_v22 }
 0x1c6   :  { %v621_v26 = vpop.f32.mrf.mxu1 }
 0x1c7   :  { %881 = vst [vmem:[%s1285_s6 + $0x10] sm:$0xff] %v846_v25   ;;  %v660_v29 = vmul.f32 %v621_v26, %v1180_v3 }
 0x1c8   :  { %v978_v52 = vpop.f32.mrf.mxu1 }
 0x1c9   :  { %v663_v28 = vmul.f32 %v978_v52, %v1200_v32 }
 0x1ca   :  { %v624_v49 = vpop.f32.mrf.mxu1 }
 0x1cb   :  { %v861_v50 = vpack.c.bf16 %v663_v28, %v662_v56  ;;  %v661_v30 = vmul.f32 %v624_v49, %v1183_v9 }
 0x1cc   :  { %v981_v31 = vpop.f32.mrf.mxu1 }
 0x1cd   :  { %884 = vst [vmem:[%s1285_s6 + $0x28] sm:$0xff] %v861_v50   ;;  %v856_v33 = vpack.c.bf16 %v661_v30, %v660_v29  ;;  %v666_v32 = vmul.f32 %v981_v31, %v1221_v17 }
 0x1ce   :  { %v637_v34 = vpop.f32.mrf.mxu1 }
 0x1cf   :  { %883 = vst [vmem:[%s1285_s6 + $0x20] sm:$0xff] %v856_v33   ;;  %v664_v36 = vmul.f32 %v637_v34, %v1205_v55 }
 0x1d0   :  { %v982_v22 = vpop.f32.mrf.mxu1 }
 0x1d1   :  { %v667_v35 = vmul.f32 %v982_v22, %v1225_v27 }
 0x1d2   :  { %v640_v3 = vpop.f32.mrf.mxu1 }
 0x1d3   :  { %v871_v9 = vpack.c.bf16 %v667_v35, %v666_v32  ;;  %v665_v37 = vmul.f32 %v640_v3, %v1208_v62 }
 0x1d5   :  { %886 = vst [vmem:[%s1285_s6 + $0x38] sm:$0xff] %v871_v9   ;;  %v866_v38 = vpack.c.bf16 %v665_v37, %v664_v36 }
 0x1d7   :  { %885 = vst [vmem:[%s1285_s6 + $0x30] sm:$0xff] %v866_v38  }

</bundles_post_ra>
